<compile_context>
chip_gen: v7x
topology: tpu7x:2x2x1
jax: 0.10.0
libtpu: 0.0.40
codegen_flags: <defaults>
</compile_context>

<pallas_src>
import functools

import numpy as np
import jax
import jax.numpy as jnp
from jax import lax
from jax.experimental import pallas as pl
from jax.experimental.pallas import tpu as pltpu

LRELU_SLOPE = 0.2
BN_EPS = 1e-5
_LANE = 128
_SUBLANE = 8
_TM_MAX = 512                     # M-tile rows; multiple of 8, sized for v7x VMEM
_VMEM_LIMIT = 48 * 1024 * 1024    # explicit scoped-VMEM limit, < 64 MiB (v7x)


def _round_up(x, m):
    return (x + m - 1) // m * m


# ------------------------------ Pallas kernels ------------------------------

def _mm_lrelu_kernel(p_ref, w_ref, o_ref):
    # conv tile (im2col matmul, bf16 in / f32 acc) + LeakyReLU(0.2) -> bf16
    acc = jnp.dot(p_ref[...], w_ref[...], preferred_element_type=jnp.float32)
    o_ref[...] = jnp.where(acc > 0, acc, LRELU_SLOPE * acc).astype(o_ref.dtype)


def _mm_stats_kernel(p_ref, w_ref, y_ref, sum_ref, sq_ref):
    # BN pass 1: conv tile + per-channel sum / sum-of-squares accumulation
    acc = jnp.dot(p_ref[...], w_ref[...], preferred_element_type=jnp.float32)
    y_ref[...] = acc

    @pl.when(pl.program_id(0) == 0)
    def _():
        sum_ref[...] = jnp.zeros_like(sum_ref)
        sq_ref[...] = jnp.zeros_like(sq_ref)

    sum_ref[...] += jnp.sum(acc, axis=0, keepdims=True)
    sq_ref[...] += jnp.sum(acc * acc, axis=0, keepdims=True)


def _bn_affine_lrelu_kernel(y_ref, sum_ref, sq_ref, g_ref, b_ref, o_ref, *, inv_m):
    # BN pass 2 (batch stats, affine) + LeakyReLU(0.2); f32 math, bf16 store
    mean = sum_ref[...] * inv_m
    var = jnp.maximum(sq_ref[...] * inv_m - mean * mean, 0.0)
    scale = lax.rsqrt(var + BN_EPS) * g_ref[...]
    shift = b_ref[...] - mean * scale
    y = y_ref[...] * scale + shift
    o_ref[...] = jnp.where(y > 0, y, LRELU_SLOPE * y).astype(o_ref.dtype)


def _bn_kernel(y_ref, sum_ref, sq_ref, o_ref, *, inv_m):
    # BN pass 2 (batch stats, affine=False) for the final layer; f32 output
    mean = sum_ref[...] * inv_m
    var = jnp.maximum(sq_ref[...] * inv_m - mean * mean, 0.0)
    o_ref[...] = ((y_ref[...] - mean) * lax.rsqrt(var + BN_EPS)).astype(o_ref.dtype)


# ------------------------------ call wrappers --------------------------------

def _compiler_params(semantics):
    return pltpu.CompilerParams(dimension_semantics=semantics,
                                vmem_limit_bytes=_VMEM_LIMIT)


def _mm_grid(M):
    tm = _TM_MAX if M >= _TM_MAX else _round_up(max(M, 1), _SUBLANE)
    return tm, _round_up(M, tm)


def _conv_matmul_pass(p, wmat, tm, mp, kp, ocp, with_stats):
    grid = (mp // tm,)
    p_spec = pl.BlockSpec((tm, kp), lambda i: (i, 0))
    w_spec = pl.BlockSpec((kp, ocp), lambda i: (0, 0))       # weight resident
    y_spec = pl.BlockSpec((tm, ocp), lambda i: (i, 0))
    stat_spec = pl.BlockSpec((1, ocp), lambda i: (0, 0))     # accumulator resident
    bytes_in = p.size * p.dtype.itemsize + wmat.size * wmat.dtype.itemsize
    if with_stats:
        return pl.pallas_call(
            _mm_stats_kernel,
            out_shape=(jax.ShapeDtypeStruct((mp, ocp), jnp.float32),
                       jax.ShapeDtypeStruct((1, ocp), jnp.float32),
                       jax.ShapeDtypeStruct((1, ocp), jnp.float32)),
            grid=grid,
            in_specs=[p_spec, w_spec],
            out_specs=(y_spec, stat_spec, stat_spec),
            # stats accumulate across M tiles -> this axis must stay sequential
            compiler_params=_compiler_params(("arbitrary",)),
            cost_estimate=pl.CostEstimate(
                flops=2 * mp * kp * ocp, transcendentals=0,
                bytes_accessed=bytes_in + mp * ocp * 4 + 2 * ocp * 4),
        )(p, wmat)
    return pl.pallas_call(
        _mm_lrelu_kernel,
        out_shape=jax.ShapeDtypeStruct((mp, ocp), jnp.bfloat16),
        grid=grid,
        in_specs=[p_spec, w_spec],
        out_specs=y_spec,
        compiler_params=_compiler_params(("parallel",)),
        cost_estimate=pl.CostEstimate(
            flops=2 * mp * kp * ocp, transcendentals=0,
            bytes_accessed=bytes_in + mp * ocp * 2),
    )(p, wmat)


def _bn_pass2(y, s1, s2, gamma, beta, tm, mp, ocp, m_real, out_dtype, affine_lrelu):
    grid = (mp // tm,)
    y_spec = pl.BlockSpec((tm, ocp), lambda i: (i, 0))
    vec_spec = pl.BlockSpec((1, ocp), lambda i: (0, 0))
    if affine_lrelu:
        kernel = functools.partial(_bn_affine_lrelu_kernel, inv_m=1.0 / m_real)
        args = (y, s1, s2, gamma, beta)
        in_specs = [y_spec, vec_spec, vec_spec, vec_spec, vec_spec]
    else:
        kernel = functools.partial(_bn_kernel, inv_m=1.0 / m_real)
        args = (y, s1, s2)
        in_specs = [y_spec, vec_spec, vec_spec]
    out_itemsize = jnp.dtype(out_dtype).itemsize
    return pl.pallas_call(
        kernel,
        out_shape=jax.ShapeDtypeStruct((mp, ocp), out_dtype),
        grid=grid,
        in_specs=in_specs,
        out_specs=y_spec,
        compiler_params=_compiler_params(("parallel",)),
        cost_estimate=pl.CostEstimate(
            flops=6 * mp * ocp, transcendentals=ocp,
            bytes_accessed=mp * ocp * (4 + out_itemsize)),
    )(*args)


# ------------------------------ JAX glue --------------------------------------

def _im2col(x_nhwc, k, stride, pad):
    # NHWC -> (N*OH*OW, k*k*C) patches, feature order (kh-major, kw, c)
    N, H, W, C = x_nhwc.shape
    xp = jnp.pad(x_nhwc, ((0, 0), (pad, pad), (pad, pad), (0, 0)))
    OH = (H + 2 * pad - k) // stride + 1
    OW = (W + 2 * pad - k) // stride + 1
    cols = [xp[:, kh:kh + stride * OH:stride, kw:kw + stride * OW:stride, :]
            for kh in range(k) for kw in range(k)]
    p = jnp.stack(cols, axis=3).reshape(N * OH * OW, k * k * C)
    return p, N, OH, OW


def _pad2d(a, rows, cols):
    return jnp.pad(a, ((0, rows - a.shape[0]), (0, cols - a.shape[1])))


def _pack_weight(w_oihw):
    # PyTorch (OC, IC, KH, KW) -> bf16 (Kp, OCp) matrix matching im2col order
    oc = w_oihw.shape[0]
    wmat = jnp.transpose(w_oihw, (2, 3, 1, 0)).reshape(-1, oc)
    kp = _round_up(wmat.shape[0], _LANE)
    ocp = _round_up(oc, _LANE)
    return _pad2d(wmat, kp, ocp).astype(jnp.bfloat16)


def _pack_bn(gamma, beta):
    oc = gamma.shape[0]
    ocp = _round_up(oc, _LANE)
    g = jnp.pad(gamma, (0, ocp - oc), constant_values=1.0).reshape(1, ocp)
    b = jnp.pad(beta, (0, ocp - oc)).reshape(1, ocp)
    return g.astype(jnp.float32), b.astype(jnp.float32)


def init_params(key, nf, image_size, n_colors):
    n_mid = int(np.log2(image_size // 8))
    keys = jax.random.split(key, n_mid + 2)

    w0 = 0.05 * jax.random.normal(keys[0], (nf, n_colors, 4, 4), jnp.float32)
    params = {"l0": {"w": _pack_weight(w0), "oc": nf}, "mid": []}
    raw = {"w0": w0, "mid": [], "w_last": None}

    mult = 1
    for i in range(n_mid):
        oc = nf * mult * 2
        wk = 0.05 * jax.random.normal(keys[1 + i], (oc, nf * mult, 4, 4), jnp.float32)
        gamma = jnp.ones((oc,), jnp.float32)     # nn.BatchNorm2d default weight
        beta = jnp.zeros((oc,), jnp.float32)     # nn.BatchNorm2d default bias
        g, b = _pack_bn(gamma, beta)
        params["mid"].append({"w": _pack_weight(wk), "oc": oc, "gamma": g, "beta": b})
        raw["mid"].append((wk, gamma, beta))
        mult *= 2

    oc_last = nf * mult * 2
    w_last = 0.05 * jax.random.normal(keys[-1], (oc_last, nf * mult, 4, 4), jnp.float32)
    params["last"] = {"w": _pack_weight(w_last), "oc": oc_last}
    raw["w_last"] = w_last
    params["raw"] = raw
    return params


def _conv_lrelu_layer(x, layer):
    wmat, oc = layer["w"], layer["oc"]
    kp, ocp = wmat.shape
    p, N, OH, OW = _im2col(x, 4, 2, 1)
    M = p.shape[0]
    tm, mp = _mm_grid(M)
    p = _pad2d(p, mp, kp)
    out = _conv_matmul_pass(p, wmat, tm, mp, kp, ocp, with_stats=False)
    return out[:M, :oc].reshape(N, OH, OW, oc)


def _conv_bn_layer(x, layer, *, pad, affine_lrelu, out_dtype):
    wmat, oc = layer["w"], layer["oc"]
    kp, ocp = wmat.shape
    p, N, OH, OW = _im2col(x, 4, 2, pad)
    M = p.shape[0]
    tm, mp = _mm_grid(M)
    p = _pad2d(p, mp, kp)
    y, s1, s2 = _conv_matmul_pass(p, wmat, tm, mp, kp, ocp, with_stats=True)
    out = _bn_pass2(y, s1, s2, layer.get("gamma"), layer.get("beta"),
                    tm, mp, ocp, M, out_dtype, affine_lrelu)
    return out[:M, :oc].reshape(N, OH, OW, oc)


def discriminator_forward(x_nchw, params):
    # NCHW (PyTorch) -> NHWC bf16 for the kernels
    x = jnp.transpose(x_nchw, (0, 2, 3, 1)).astype(jnp.bfloat16)

    # Conv2d(k4,s2,p1,bias=False) + LeakyReLU(0.2)
    x = _conv_lrelu_layer(x, params["l0"])

    # [Conv2d(k4,s2,p1) + BatchNorm2d + LeakyReLU(0.2)] x n_mid
    for layer in params["mid"]:
        x = _conv_bn_layer(x, layer, pad=1, affine_lrelu=True,
                           out_dtype=jnp.bfloat16)

    # Conv2d(k4,s2,p0) + BatchNorm2d(affine=False)
    y = _conv_bn_layer(x, params["last"], pad=0, affine_lrelu=False,
                       out_dtype=jnp.float32)                    # (N, 1, 1, OC)

    N = y.shape[0]
    return jnp.transpose(y, (0, 3, 1, 2)).reshape(N, -1)


def reference_forward(x_nchw, params):
    # Pure-JAX reference mirroring the kernel's bf16-matmul / f32-math scheme.
    raw = params["raw"]

    def conv(v, w, pad):
        return lax.conv_general_dilated(
            v.astype(jnp.bfloat16), w.astype(jnp.bfloat16),
            window_strides=(2, 2), padding=[(pad, pad), (pad, pad)],
            dimension_numbers=("NCHW", "OIHW", "NCHW"),
            preferred_element_type=jnp.float32)

    def lrelu(v):
        return jnp.where(v > 0, v, LRELU_SLOPE * v)

    def bn(v, gamma=None, beta=None):
        mean = jnp.mean(v, axis=(0, 2, 3), keepdims=True)
        var = jnp.mean((v - mean) ** 2, axis=(0, 2, 3), keepdims=True)
        out = (v - mean) * lax.rsqrt(var + BN_EPS)
        if gamma is not None:
            out = out * gamma.reshape(1, -1, 1, 1) + beta.reshape(1, -1, 1, 1)
        return out

    y = lrelu(conv(x_nchw, raw["w0"], 1)).astype(jnp.bfloat16)
    for wk, gamma, beta in raw["mid"]:
        y = lrelu(bn(conv(y, wk, 1), gamma, beta)).astype(jnp.bfloat16)
    y = bn(conv(y, raw["w_last"], 0))
    return y.reshape(y.shape[0], -1)


if __name__ == "__main__":
    batch, n_colors, image_size, nf = 2, 3, 16, 4   # small, consistent shapes
    key = jax.random.PRNGKey(0)
    kx, kp = jax.random.split(key)
    x = jax.random.normal(kx, (batch, n_colors, image_size, image_size),
                          jnp.float32)
    params = init_params(kp, nf, image_size, n_colors)

    out = jax.block_until_ready(discriminator_forward(x, params))

    n_mid = int(np.log2(image_size // 8))
    expected_oc = nf * (2 ** (n_mid + 1))
    assert out.shape == (batch, expected_oc), out.shape
    assert bool(jnp.all(jnp.isfinite(out)))

    ref = jax.block_until_ready(reference_forward(x, params))
    np.testing.assert_allclose(np.asarray(out, dtype=np.float32),
                               np.asarray(ref, dtype=np.float32),
                               rtol=5e-2, atol=5e-2)

    print("KERNEL_OK")
</pallas_src>

<mosaic_0001>
module attributes {stable_mosaic.version = 11 : i64} {
  func.func @_mm_lrelu_kernel(%arg0: i32, %arg1: memref<128x128xbf16, #tpu.memory_space<vmem>>, %arg2: memref<128x128xbf16, #tpu.memory_space<vmem>>, %arg3: memref<128x128xbf16, #tpu.memory_space<vmem>>) attributes {dimension_semantics = [#tpu.dimension_semantics<parallel>], iteration_bounds = array<i64: 1>, scalar_prefetch = 0 : i64, scratch_operands = 0 : i64, tpu.core_type = #tpu.core_type<tc>, window_params = [{transform_indices = @transform_0, window_bounds = array<i64: 128, 128>}, {pipeline_mode = #tpu.pipeline_mode<synchronous>, transform_indices = @transform_1, window_bounds = array<i64: 128, 128>}, {transform_indices = @transform_2, window_bounds = array<i64: 128, 128>}]} {
    %c0 = arith.constant 0 : index
    %c0_0 = arith.constant 0 : index
    %0 = vector.load %arg1[%c0, %c0_0] : memref<128x128xbf16, #tpu.memory_space<vmem>>, vector<128x128xbf16>
    %c0_1 = arith.constant 0 : index
    %c0_2 = arith.constant 0 : index
    %1 = vector.load %arg2[%c0_1, %c0_2] : memref<128x128xbf16, #tpu.memory_space<vmem>>, vector<128x128xbf16>
    %cst = arith.constant dense<0.000000e+00> : vector<128x128xf32>
    %2 = tpu.matmul %0, %1, %cst {dimension_numbers = #tpu.dot_dimension_numbers<[1], [0], [0], [1], [0, 0, 1, 1], [], []>} : vector<128x128xbf16>, vector<128x128xbf16>, vector<128x128xf32> -> vector<128x128xf32>
    %cst_3 = arith.constant 0.000000e+00 : f32
    %3 = vector.broadcast %cst_3 : f32 to vector<128x128xf32>
    %4 = arith.cmpf ogt, %2, %3 : vector<128x128xf32>
    %cst_4 = arith.constant 2.000000e-01 : f32
    %5 = vector.broadcast %cst_4 : f32 to vector<128x128xf32>
    %6 = arith.mulf %5, %2 : vector<128x128xf32>
    %7 = arith.select %4, %2, %6 : vector<128x128xi1>, vector<128x128xf32>
    %8 = arith.truncf %7 : vector<128x128xf32> to vector<128x128xbf16>
    %c0_5 = arith.constant 0 : index
    %c0_6 = arith.constant 0 : index
    %9 = vector.load %arg3[%c0_5, %c0_6] : memref<128x128xbf16, #tpu.memory_space<vmem>>, vector<128x128xbf16>
    tpu.vector_store %arg3[%c0_5, %c0_6], %8 {strides = array<i32>} : memref<128x128xbf16, #tpu.memory_space<vmem>>, vector<128x128xbf16>,
    return
  }
  func.func @transform_0(%arg0: i32) -> (i32, i32) {
    %c0_i32 = arith.constant 0 : i32
    %c0_i32_0 = arith.constant 0 : i32
    return %arg0, %c0_i32 : i32, i32
  }
  func.func @transform_1(%arg0: i32) -> (i32, i32) {
    %c0_i32 = arith.constant 0 : i32
    %c0_i32_0 = arith.constant 0 : i32
    %c0_i32_1 = arith.constant 0 : i32
    return %c0_i32, %c0_i32_0 : i32, i32
  }
  func.func @transform_2(%arg0: i32) -> (i32, i32) {
    %c0_i32 = arith.constant 0 : i32
    %c0_i32_0 = arith.constant 0 : i32
    return %arg0, %c0_i32 : i32, i32
  }
}

</mosaic_0001>

<bundles_post_ra>
// kernel: tpu_custom_call.1
= control target key start
LH: loop header
LB: loop body
LE: loop exit
PB: predicated region body
PF: predicated region fallthrough
CT: control target
= control target key end

     0   :  { %7 = vsyncpa [#allocation3], 0  ;;  %s731_s0 = inlined_call_operand.hbm [shape: bf16[128,128], index: 0, kind: input, shape index: {}]   ;;  %s732_s1 = inlined_call_operand.hbm [shape: bf16[128,128], index: 1, kind: input, shape index: {}]   ;;  %s733_s2 = inlined_call_operand.hbm [shape: bf16[128,128], index: 2, kind: output, shape index: {}]  }
   0x1   :  { %8 = vsyncpa [#allocation6], 0 }
   0x2   :  { %9 = vsyncpa [#allocation4], 0  ;;  %s664_s9 = smov [#allocation2]   ;;  %s592_s13 = scalar_lea.hbm %s731_s0, 1024 }
   0x3   :  { %s15_s10 = sshll.u32 %s664_s9, 4  ;;  %p593_p0 = scmp.ne.s32.totalorder %s731_s0, %s592_s13  ;;  %s16_s10 = int_to_ptr.vmem [resolvable:$true] %s15_s10 }
   0x4   :  { %p596_p1 = scmp.lt.u32.totalorder %s592_s13, %s731_s0 }
   0x6   :  { %p598_p2 = pnand %p596_p1, %p593_p0 }
   0x8   :  { %601 = shalt.err (!%p598_p2)
}
   0x9   :  { %s602_s18 = scalar_lea.vmem %s16_s10, 1024  ;;  %p607_p4 = scmp.lt.s32.totalorder %s16_s10, %s16_s10 }
   0xa   :  { %p603_p3 = scmp.ne.s32.totalorder %s16_s10, %s602_s18  ;;  %p608_p5 = scmp.lt.s32.totalorder %s602_s18, %s602_s18 }
   0xc   :  { %p609_p6 = por %p608_p5, %p607_p4 }
   0xe   :  { %p610_p7 = pnand %p609_p6, %p603_p3 }
  0x10   :  { %613 = shalt.err (!%p610_p7)
}
  0x11   :  { %s665_s19 = smov 64   ;;  %s666_s20 = smov 4  }
  0x12   :  { %21 = dma.hbm_to_vmem [thread:$0]  %s731_s0, 1024, %s16_s10, [#allocation3], %s665_s19, %s665_s19, %s666_s20  }
  0x13   :  { %s667_s23 = smov [#allocation5]   ;;  %s614_s27 = scalar_lea.hbm %s732_s1, 1024 }
  0x14   :  { %s27_s24 = sshll.u32 %s667_s23, 4  ;;  %p615_p8 = scmp.ne.s32.totalorder %s732_s1, %s614_s27  ;;  %s28_s24 = int_to_ptr.vmem [resolvable:$true] %s27_s24 }
  0x15   :  { %p618_p9 = scmp.lt.u32.totalorder %s614_s27, %s732_s1 }
  0x17   :  { %p620_p10 = pnand %p618_p9, %p615_p8 }
  0x19   :  { %623 = shalt.err (!%p620_p10)
}
  0x1a   :  { %s624_s4 = scalar_lea.vmem %s28_s24, 1024  ;;  %p629_p12 = scmp.lt.s32.totalorder %s28_s24, %s28_s24 }
  0x1b   :  { %p625_p11 = scmp.ne.s32.totalorder %s28_s24, %s624_s4  ;;  %p630_p13 = scmp.lt.s32.totalorder %s624_s4, %s624_s4 }
  0x1d   :  { %p631_p0 = por %p630_p13, %p629_p12 }
  0x1f   :  { %p632_p1 = pnand %p631_p0, %p625_p11 }
  0x21   :  { %635 = shalt.err (!%p632_p1)
}
  0x22   :  { %33 = dma.hbm_to_vmem [thread:$0]  %s732_s1, 1024, %s28_s24, [#allocation6], %s665_s19, %s665_s19, %s666_s20  }
  0x23   :  { %658 = dma.done.wait [#allocation3], 1024  }
  0x24   :  { %659 = vsyncadd [#allocation3], 4294966272 }
  0x25   :  { %660 = dma.done.wait [#allocation6], 1024  }
  0x26   :  { %661 = vsyncadd [#allocation6], 4294966272  ;;  %v576_v0 = vld [vmem:[#allocation5] sm:$0xff]   ;;  %v577_v1 = vld [vmem:[#allocation5 + $0x8] sm:$0xff]   ;;  %s668_s1 = smov [#allocation7]  }
  0x27   :  { %523 = vmatprep.subr.bf16.mxu0 %v576_v0  ;;  %555 = vmatprep.subr.bf16.mxu1 %v576_v0  ;;  %v578_v2 = vld [vmem:[#allocation5 + $0x10] sm:$0xff]   ;;  %v579_v3 = vld [vmem:[#allocation5 + $0x18] sm:$0xff]   ;;  %v584_v4 = vld [vmem:[#allocation2] sm:$0xff]   ;;  %s399_s6 = sshll.u32 %s668_s1, 4  ;;  %s400_s6 = int_to_ptr.vmem [resolvable:$true] %s399_s6 }
  0x28   :  { %524 = vmatpush3.bf16.msra.mxu0 %v576_v0  ;;  %563 = vmatpush3.bf16.msra.mxu1 %v576_v0  ;;  %v585_v5 = vld [vmem:[#allocation2 + $0x20] sm:$0xff]   ;;  %v581_v7 = vld [vmem:[#allocation5 + $0x28] sm:$0xff]   ;;  %v582_v8 = vld [vmem:[#allocation5 + $0x30] sm:$0xff]   ;;  %s636_s7 = scalar_lea.vmem %s400_s6, 1024  ;;  %p641_p3 = scmp.lt.s32.totalorder %s400_s6, %s400_s6 }
  0x29   :  { %525 = vmatprep.subr.bf16.mxu0 %v577_v1  ;;  %556 = vmatprep.subr.bf16.mxu1 %v577_v1  ;;  %v580_v6 = vld [vmem:[#allocation5 + $0x20] sm:$0xff]   ;;  %v583_v9 = vld [vmem:[#allocation5 + $0x38] sm:$0xff]   ;;  %v586_v10 = vld [vmem:[#allocation2 + $0x8] sm:$0xff]   ;;  %p637_p2 = scmp.ne.s32.totalorder %s400_s6, %s636_s7  ;;  %p642_p4 = scmp.lt.s32.totalorder %s636_s7, %s636_s7 }
  0x2a   :  { %539 = vmatprep.mubr.bf16.mxu0 %v584_v4  ;;  %547 = vmatprep.mubr.bf16.mxu1 %v585_v5  ;;  %v587_v11 = vld [vmem:[#allocation2 + $0x28] sm:$0xff]   ;;  %v588_v12 = vld [vmem:[#allocation2 + $0x10] sm:$0xff]   ;;  %v590_v14 = vld [vmem:[#allocation2 + $0x18] sm:$0xff]  }
  0x2b   :  { %v589_v13 = vld [vmem:[#allocation2 + $0x30] sm:$0xff]   ;;  %v591_v15 = vld [vmem:[#allocation2 + $0x38] sm:$0xff]   ;;  %p643_p5 = por %p642_p4, %p641_p3 }
  0x2c   :  { %526 = vmatpush3.bf16.msra.mxu0 %v577_v1  ;;  %564 = vmatpush3.bf16.msra.mxu1 %v577_v1 }
  0x2d   :  { %527 = vmatprep.subr.bf16.mxu0 %v578_v2  ;;  %557 = vmatprep.subr.bf16.mxu1 %v578_v2  ;;  %p644_p6 = pnand %p643_p5, %p637_p2 }
  0x30   :  { %528 = vmatpush3.bf16.msra.mxu0 %v578_v2  ;;  %565 = vmatpush3.bf16.msra.mxu1 %v578_v2 }
  0x31   :  { %529 = vmatprep.subr.bf16.mxu0 %v579_v3  ;;  %558 = vmatprep.subr.bf16.mxu1 %v579_v3 }
  0x34   :  { %530 = vmatpush3.bf16.msra.mxu0 %v579_v3  ;;  %566 = vmatpush3.bf16.msra.mxu1 %v579_v3 }
  0x35   :  { %531 = vmatprep.subr.bf16.mxu0 %v580_v6  ;;  %559 = vmatprep.subr.bf16.mxu1 %v580_v6 }
  0x38   :  { %532 = vmatpush3.bf16.msra.mxu0 %v580_v6  ;;  %567 = vmatpush3.bf16.msra.mxu1 %v580_v6 }
  0x39   :  { %533 = vmatprep.subr.bf16.mxu0 %v581_v7  ;;  %560 = vmatprep.subr.bf16.mxu1 %v581_v7 }
  0x3c   :  { %534 = vmatpush3.bf16.msra.mxu0 %v581_v7  ;;  %568 = vmatpush3.bf16.msra.mxu1 %v581_v7 }
  0x3d   :  { %535 = vmatprep.subr.bf16.mxu0 %v582_v8  ;;  %561 = vmatprep.subr.bf16.mxu1 %v582_v8 }
  0x40   :  { %536 = vmatpush3.bf16.msra.mxu0 %v582_v8  ;;  %569 = vmatpush3.bf16.msra.mxu1 %v582_v8 }
  0x41   :  { %537 = vmatprep.subr.bf16.mxu0 %v583_v9  ;;  %562 = vmatprep.subr.bf16.mxu1 %v583_v9 }
  0x44   :  { %538 = vmatpush3.bf16.msra.mxu0 %v583_v9  ;;  %570 = vmatpush3.bf16.msra.mxu1 %v583_v9 }
  0x47   :  { %540 = vmatmul.mubr.bf16.vlgmr.msra.gmra.mrb[0].mxu0 %v586_v10  ;;  %548 = vmatmul.mubr.bf16.vlgmr.msra.gmra.mrb[0].mxu1 %v587_v11 }
  0x48   :  { %543 = vmatprep.mubr.bf16.mxu0 %v588_v12  ;;  %551 = vmatprep.mubr.bf16.mxu1 %v589_v13 }
  0x4f   :  { %544 = vmatmul.mubr.bf16.gmra.mrb[4].mxu0 %v590_v14  ;;  %552 = vmatmul.mubr.bf16.gmra.mrb[4].mxu1 %v591_v15 }
 0x11a   :  { %v541_v16 = vpop.f32.mrb[0].mxu0  ;;  %v549_v17 = vpop.f32.mrb[0].mxu1 }
 0x11b   :  { %vm268_vm0 = vcmp.gt.f32.partialorder %v541_v16, 0.0  ;;  %v284_v18 = vmul.f32 0.2, %v541_v16  ;;  %v292_v19 = vmul.f32 0.2, %v549_v17  ;;  %vm276_vm1 = vcmp.gt.f32.partialorder %v549_v17, 0.0 }
 0x11c   :  { %v203_v20 = vpop.f32.mrb[1].mxu0  ;;  %v235_v21 = vpop.f32.mrb[1].mxu1 }
 0x11d   :  { %v282_v22 = vmul.f32 0.2, %v203_v20  ;;  %v542_v23 = vpop.f32.mrb[2].mxu0  ;;  %v550_v24 = vpop.f32.mrb[2].mxu1  ;;  %v300_v25 = vsel %vm268_vm0, %v541_v16, %v284_v18  ;;  %v290_v26 = vmul.f32 0.2, %v235_v21  ;;  %v308_v28 = vsel %vm276_vm1, %v549_v17, %v292_v19 }
 0x11e   :  { %vm269_vm2 = vcmp.gt.f32.partialorder %v542_v23, 0.0  ;;  %v285_v27 = vmul.f32 0.2, %v542_v23  ;;  %vm266_vm3 = vcmp.gt.f32.partialorder %v203_v20, 0.0  ;;  %vm277_vm4 = vcmp.gt.f32.partialorder %v550_v24, 0.0  ;;  %v206_v30 = vpop.f32.mrb[3].mxu0 }
 0x11f   :  { %v293_v29 = vmul.f32 0.2, %v550_v24  ;;  %v238_v31 = vpop.f32.mrb[3].mxu1  ;;  %vm274_vm5 = vcmp.gt.f32.partialorder %v235_v21, 0.0  ;;  %vm267_vm6 = vcmp.gt.f32.partialorder %v206_v30, 0.0  ;;  %v298_v37 = vsel %vm266_vm3, %v203_v20, %v282_v22 }
 0x120   :  { %v301_v32 = vsel %vm269_vm2, %v542_v23, %v285_v27  ;;  %v283_v33 = vmul.f32 0.2, %v206_v30  ;;  %vm275_vm7 = vcmp.gt.f32.partialorder %v238_v31, 0.0  ;;  %v291_v36 = vmul.f32 0.2, %v238_v31 }
 0x121   :  { %v468_v34 = vpack.c.bf16 %v301_v32, %v300_v25  ;;  %v309_v35 = vsel %vm277_vm4, %v550_v24, %v293_v29  ;;  %v306_v42 = vsel %vm274_vm5, %v235_v21, %v290_v26 }
 0x122   :  { %v488_v38 = vpack.c.bf16 %v309_v35, %v308_v28  ;;  %v299_v39 = vsel %vm267_vm6, %v206_v30, %v283_v33  ;;  %v545_v40 = vpop.f32.mrb[4].mxu0  ;;  %v553_v41 = vpop.f32.mrb[4].mxu1  ;;  %v307_v44 = vsel %vm275_vm7, %v238_v31, %v291_v36 }
 0x123   :  { %500 = vst [vmem:[#allocation7 + $0x8] sm:$0xff] %v468_v34   ;;  %v463_v43 = vpack.c.bf16 %v299_v39, %v298_v37  ;;  %v288_v45 = vmul.f32 0.2, %v545_v40  ;;  %v219_v46 = vpop.f32.mrb[5].mxu0  ;;  %v251_v47 = vpop.f32.mrb[5].mxu1  ;;  %v483_v48 = vpack.c.bf16 %v307_v44, %v306_v42  ;;  %vm272_vm8 = vcmp.gt.f32.partialorder %v545_v40, 0.0 }
 0x124   :  { %504 = vst [vmem:[#allocation7 + $0x28] sm:$0xff] %v488_v38   ;;  %v296_v49 = vmul.f32 0.2, %v553_v41  ;;  %v546_v50 = vpop.f32.mrb[6].mxu0  ;;  %v554_v51 = vpop.f32.mrb[6].mxu1  ;;  %vm280_vm9 = vcmp.gt.f32.partialorder %v553_v41, 0.0 }
 0x125   :  { %464 = vst [vmem:[#allocation7] sm:$0xff] %v463_v43   ;;  %v286_v52 = vmul.f32 0.2, %v219_v46  ;;  %v294_v53 = vmul.f32 0.2, %v251_v47  ;;  %v222_v54 = vpop.f32.mrb[7].mxu0  ;;  %v304_v57 = vsel %vm272_vm8, %v545_v40, %v288_v45 }
 0x126   :  { %503 = vst [vmem:[#allocation7 + $0x20] sm:$0xff] %v483_v48   ;;  %vm270_vm10 = vcmp.gt.f32.partialorder %v219_v46, 0.0  ;;  %vm273_vm11 = vcmp.gt.f32.partialorder %v546_v50, 0.0  ;;  %v289_v55 = vmul.f32 0.2, %v546_v50  ;;  %vm281_vm12 = vcmp.gt.f32.partialorder %v554_v51, 0.0 }
 0x127   :  { %v254_v56 = vpop.f32.mrb[7].mxu1  ;;  %vm278_vm13 = vcmp.gt.f32.partialorder %v251_v47, 0.0  ;;  %v297_v58 = vmul.f32 0.2, %v554_v51  ;;  %vm271_vm14 = vcmp.gt.f32.partialorder %v222_v54, 0.0  ;;  %v312_v62 = vsel %vm280_vm9, %v553_v41, %v296_v49 }
 0x128   :  { %v305_v59 = vsel %vm273_vm11, %v546_v50, %v289_v55  ;;  %v287_v60 = vmul.f32 0.2, %v222_v54  ;;  %vm279_vm15 = vcmp.gt.f32.partialorder %v254_v56, 0.0  ;;  %v295_v61 = vmul.f32 0.2, %v254_v56 }
 0x129   :  { %v302_v63 = vsel %vm270_vm10, %v219_v46, %v286_v52  ;;  %v478_v0 = vpack.c.bf16 %v305_v59, %v304_v57  ;;  %v313_v1 = vsel %vm281_vm12, %v554_v51, %v297_v58  ;;  %v310_v2 = vsel %vm278_vm13, %v251_v47, %v294_v53 }
 0x12a   :  { %v498_v3 = vpack.c.bf16 %v313_v1, %v312_v62  ;;  %v303_v4 = vsel %vm271_vm14, %v222_v54, %v287_v60  ;;  %v311_v5 = vsel %vm279_vm15, %v254_v56, %v295_v61 }
 0x12b   :  { %502 = vst [vmem:[#allocation7 + $0x18] sm:$0xff] %v478_v0   ;;  %v473_v6 = vpack.c.bf16 %v303_v4, %v302_v63  ;;  %v493_v7 = vpack.c.bf16 %v311_v5, %v310_v2 }
 0x12c   :  { %506 = vst [vmem:[#allocation7 + $0x38] sm:$0xff] %v498_v3  }
 0x12d   :  { %501 = vst [vmem:[#allocation7 + $0x10] sm:$0xff] %v473_v6   ;;  %505 = vst [vmem:[#allocation7 + $0x30] sm:$0xff] %v493_v7  }
 0x12e   :  { %647 = shalt.err (!%p644_p6)
}
 0x12f   :  { %s648_s10 = scalar_lea.hbm %s733_s2, 1024 }
 0x130   :  { %p649_p7 = scmp.ne.s32.totalorder %s733_s2, %s648_s10  ;;  %p652_p8 = scmp.lt.u32.totalorder %s648_s10, %s733_s2 }
 0x132   :  { %p654_p9 = pnand %p652_p8, %p649_p7 }
 0x134   :  { %657 = shalt.err (!%p654_p9)
}
 0x135   :  { %405 = dma.vmem_to_hbm [thread:$0]  %s400_s6, 1024, %s733_s2, [#allocation4], %s665_s19, %s665_s19, %s666_s20  }
 0x136   :  { %662 = dma.done.wait [#allocation4], 1024  }
 0x137   :  { %663 = vsyncadd [#allocation4], 4294966272 }
 0x138   :  { %409 = vsyncpa [#allocation3], 1 }
 0x139   :  { %410 = vsyncpa [#allocation6], 1 }
 0x13a   :  { %411 = vsyncpa [#allocation4], 1 }

</bundles_post_ra>
